<compile_context>
chip_gen: v7x
topology: tpu7x:2x2x1
jax: 0.10.0
libtpu: 0.0.40
codegen_flags: <defaults>
</compile_context>

<pallas_src>
import functools

import numpy as np
import jax
import jax.numpy as jnp
from jax.experimental import pallas as pl
from jax.experimental.pallas import tpu as pltpu

_LANE = 128
_SUBLANE = 8


def _round_up(x: int, m: int) -> int:
    return ((x + m - 1) // m) * m


def _cdiv(a: int, b: int) -> int:
    return -(-a // b)


@functools.lru_cache(maxsize=None)
def _vmem_limit_bytes():
    """~80% of this chip's VMEM (v5e/v6e: ~102 MiB, v7x: ~52 MiB); None -> compiler default."""
    try:
        cap = int(pltpu.get_tpu_info().vmem_capacity_bytes)
        return int(cap * 0.8)
    except Exception:
        return None


def _mlp_kernel(x_ref, w1_ref, b1_ref, w2_ref, b2_ref, w3_ref, b3_ref, out_ref):
    """Fused 3-layer MLP forward on one (tile_b, D) batch tile.

    x/w*: MXU operand dtype (bf16 by default), b*: f32.
    Matmuls accumulate in f32; bias add + ReLU stay f32 (good on all of v5e/v6e/v7x).
    Dropout is identity at inference, so it is a no-op here.
    """
    x = x_ref[...]

    # Layer 1: Linear + ReLU   (Dropout -> identity at inference)
    h1 = jnp.dot(x, w1_ref[...], preferred_element_type=jnp.float32) + b1_ref[...]
    h1 = jnp.maximum(h1, 0.0)

    # Layer 2: Linear + ReLU   (Dropout -> identity at inference)
    h2 = jnp.dot(h1.astype(w2_ref.dtype), w2_ref[...],
                 preferred_element_type=jnp.float32) + b2_ref[...]
    h2 = jnp.maximum(h2, 0.0)

    # Layer 3: Linear (logits); Cp is a multiple of 128 -> unmasked lane-dense store.
    logits = jnp.dot(h2.astype(w3_ref.dtype), w3_ref[...],
                     preferred_element_type=jnp.float32) + b3_ref[...]
    out_ref[...] = logits.astype(out_ref.dtype)


def prepare_params(params, compute_dtype=jnp.bfloat16):
    """Pad (H, C lane-dense) + cast the weights ONCE; reuse the result across forward calls.

    params: dict with w1 [D,H], b1 [1,H], w2 [H,H], b2 [1,H], w3 [H,C], b3 [1,C]
    compute_dtype: MXU operand dtype (bf16 default; pass jnp.float32 for an exact f32 path).
    The contraction dim D is intentionally NOT padded.
    """
    w1, b1 = params["w1"], params["b1"]
    w2, b2 = params["w2"], params["b2"]
    w3, b3 = params["w3"], params["b3"]

    D, H = w1.shape
    C = w3.shape[1]
    Hp = _round_up(H, _LANE)
    Cp = _round_up(C, _LANE)

    def pad2(a, rows, cols):
        return jnp.pad(a, ((0, rows - a.shape[0]), (0, cols - a.shape[1])))

    # Zero padding is exact: padded bias lanes are 0, ReLU(0)=0, padded weight rows are 0,
    # padded logit columns are sliced off in the wrapper.
    return {
        "w1": pad2(w1, D, Hp).astype(compute_dtype),
        "b1": pad2(b1, 1, Hp).astype(jnp.float32),
        "w2": pad2(w2, Hp, Hp).astype(compute_dtype),
        "b2": pad2(b2, 1, Hp).astype(jnp.float32),
        "w3": pad2(w3, Hp, Cp).astype(compute_dtype),
        "b3": pad2(b3, 1, Cp).astype(jnp.float32),
    }


@functools.partial(
    jax.jit,
    static_argnames=("num_classes", "tile_b", "out_dtype", "single_buffer_weights"),
)
def _forward_impl(features, prepared, *, num_classes, tile_b, out_dtype,
                  single_buffer_weights):
    w1, b1 = prepared["w1"], prepared["b1"]
    w2, b2 = prepared["w2"], prepared["b2"]
    w3, b3 = prepared["w3"], prepared["b3"]

    B, D = features.shape
    assert w1.shape[0] == D, "features dim does not match prepared params"
    Hp = w1.shape[1]
    Cp = w3.shape[1]
    compute_dtype = w1.dtype

    # Batch tiling: remainder-aware, <=512 rows per step (two clean 256-row MXU passes on
    # v6e/v7x, handled as 128-granules on v5e), and >=2 grid steps whenever possible so
    # dimension_semantics=("parallel",) can shard the batch across both v7x TensorCores.
    if tile_b is None:
        max_tile = 512
        min_steps = 2 if B > _SUBLANE else 1
        n_steps = max(min_steps, _cdiv(B, max_tile))
        tb = _round_up(_cdiv(B, n_steps), _SUBLANE)
    else:
        tb = _round_up(int(tile_b), _SUBLANE)
    Bp = _round_up(B, tb)

    # Only the (small) activations are padded/cast per call; weights were prepared once.
    xp = jnp.pad(features, ((0, Bp - B), (0, 0))).astype(compute_dtype)

    grid = (Bp // tb,)

    # Weights/biases are VMEM-resident across all batch tiles. Their block index never
    # changes, so single-buffer them (halves resident-weight VMEM; matters most on v7x).
    if single_buffer_weights:
        def resident(shape):
            return pl.BlockSpec(shape, lambda i: (0, 0), pipeline_mode=pl.Buffered(1))
    else:
        def resident(shape):
            return pl.BlockSpec(shape, lambda i: (0, 0))

    weight_bytes = sum(int(a.size) * a.dtype.itemsize for a in (w1, b1, w2, b2, w3, b3))
    cost = pl.CostEstimate(
        flops=2 * Bp * (D * Hp + Hp * Hp + Hp * Cp),
        transcendentals=0,
        bytes_accessed=int(weight_bytes
                           + Bp * D * np.dtype(compute_dtype).itemsize
                           + Bp * Cp * np.dtype(out_dtype).itemsize),
    )

    out_padded = pl.pallas_call(
        _mlp_kernel,
        out_shape=jax.ShapeDtypeStruct((Bp, Cp), out_dtype),
        grid_spec=pl.GridSpec(
            grid=grid,
            in_specs=[
                pl.BlockSpec((tb, D), lambda i: (i, 0)),   # x: streamed per batch tile
                resident((D, Hp)),                          # w1 (K dim unpadded)
                resident((1, Hp)),                          # b1
                resident((Hp, Hp)),                         # w2
                resident((1, Hp)),                          # b2
                resident((Hp, Cp)),                         # w3
                resident((1, Cp)),                          # b3
            ],
            out_specs=pl.BlockSpec((tb, Cp), lambda i: (i, 0)),
        ),
        compiler_params=pltpu.CompilerParams(
            dimension_semantics=("parallel",),   # megacore / dual-TC sharding over batch
            vmem_limit_bytes=_vmem_limit_bytes(),
        ),
        cost_estimate=cost,
    )(xp, w1, b1, w2, b2, w3, b3)

    return out_padded[:B, :num_classes]


def feature_classifier_forward(features, prepared_params, *, num_classes,
                               tile_b=None, out_dtype=jnp.float32):
    """Fused MLP forward.

    features:        [B, input_size] float32
    prepared_params: output of prepare_params(params) (padded + pre-cast, build it ONCE)
    returns:         logits [B, num_classes] in out_dtype (f32 default; bf16 halves
                     writeback bytes if the caller can accept it)
    """
    kwargs = dict(num_classes=num_classes, tile_b=tile_b, out_dtype=out_dtype)
    try:
        return _forward_impl(features, prepared_params,
                             single_buffer_weights=True, **kwargs)
    except Exception:
        # Fallback for JAX/Mosaic versions without single-buffer pipeline_mode on TPU.
        return _forward_impl(features, prepared_params,
                             single_buffer_weights=False, **kwargs)


def init_params(key, input_size, hidden_size, num_classes):
    """Deterministic init mimicking nn.Linear's U(-1/sqrt(fan_in), 1/sqrt(fan_in))."""
    ks = jax.random.split(key, 6)

    def linear(kw, kb, fan_in, fan_out):
        bound = 1.0 / jnp.sqrt(float(fan_in))
        w = jax.random.uniform(kw, (fan_in, fan_out), jnp.float32, -bound, bound)
        b = jax.random.uniform(kb, (1, fan_out), jnp.float32, -bound, bound)
        return w, b

    w1, b1 = linear(ks[0], ks[1], input_size, hidden_size)
    w2, b2 = linear(ks[2], ks[3], hidden_size, hidden_size)
    w3, b3 = linear(ks[4], ks[5], hidden_size, num_classes)
    return {"w1": w1, "b1": b1, "w2": w2, "b2": b2, "w3": w3, "b3": b3}


def _reference_forward(features, p, compute_dtype=jnp.bfloat16):
    """Pure-JAX reference using the same matmul operand dtype / f32 accumulation."""
    x = features.astype(compute_dtype)
    h1 = jnp.dot(x, p["w1"].astype(compute_dtype),
                 preferred_element_type=jnp.float32) + p["b1"]
    h1 = jnp.maximum(h1, 0.0)
    h2 = jnp.dot(h1.astype(compute_dtype), p["w2"].astype(compute_dtype),
                 preferred_element_type=jnp.float32) + p["b2"]
    h2 = jnp.maximum(h2, 0.0)
    return jnp.dot(h2.astype(compute_dtype), p["w3"].astype(compute_dtype),
                   preferred_element_type=jnp.float32) + p["b3"]


if __name__ == "__main__":
    key = jax.random.PRNGKey(0)
    k_params, k_x = jax.random.split(key)

    batch = 16
    input_size = 16
    hidden_size = 32
    num_classes = 4

    params = init_params(k_params, input_size, hidden_size, num_classes)
    features = jax.random.normal(k_x, (batch, input_size), jnp.float32)

    # Default path: bf16 MXU operands, f32 accumulation. Weights padded/cast ONCE here.
    # (B=16 -> default tiling picks tile_b=8, grid=(2,), exercising the multi-step grid.)
    prepared_bf16 = prepare_params(params, compute_dtype=jnp.bfloat16)
    logits = feature_classifier_forward(features, prepared_bf16, num_classes=num_classes)
    logits = jax.block_until_ready(logits)

    assert logits.shape == (batch, num_classes)
    ref_bf16 = _reference_forward(features, params, compute_dtype=jnp.bfloat16)
    assert jnp.allclose(logits, ref_bf16, atol=2e-2, rtol=2e-2), "bf16 path mismatch"

    # Accuracy-sensitive path: f32 MXU operands (exact FeatureClassifier semantics).
    prepared_f32 = prepare_params(params, compute_dtype=jnp.float32)
    logits_f32 = jax.block_until_ready(
        feature_classifier_forward(features, prepared_f32, num_classes=num_classes))
    ref_f32 = _reference_forward(features, params, compute_dtype=jnp.float32)
    assert logits_f32.shape == (batch, num_classes)
    assert jnp.allclose(logits_f32, ref_f32, atol=2e-2, rtol=2e-2), "f32 path mismatch"

    print("KERNEL_OK")
</pallas_src>

<mosaic_0001>
module attributes {stable_mosaic.version = 11 : i64} {
  func.func @_mlp_kernel(%arg0: i32, %arg1: memref<8x16xbf16, #tpu.memory_space<vmem>>, %arg2: memref<16x128xbf16, #tpu.memory_space<vmem>>, %arg3: memref<1x128xf32, #tpu.memory_space<vmem>>, %arg4: memref<128x128xbf16, #tpu.memory_space<vmem>>, %arg5: memref<1x128xf32, #tpu.memory_space<vmem>>, %arg6: memref<128x128xbf16, #tpu.memory_space<vmem>>, %arg7: memref<1x128xf32, #tpu.memory_space<vmem>>, %arg8: memref<8x128xf32, #tpu.memory_space<vmem>>) attributes {dimension_semantics = [#tpu.dimension_semantics<parallel>], iteration_bounds = array<i64: 2>, scalar_prefetch = 0 : i64, scratch_operands = 0 : i64, tpu.core_type = #tpu.core_type<tc>, window_params = [{transform_indices = @transform_0, window_bounds = array<i64: 8, 16>}, {pipeline_mode = #tpu.pipeline_mode<synchronous>, transform_indices = @transform_1, window_bounds = array<i64: 16, 128>}, {pipeline_mode = #tpu.pipeline_mode<synchronous>, transform_indices = @transform_2, window_bounds = array<i64: 1, 128>}, {pipeline_mode = #tpu.pipeline_mode<synchronous>, transform_indices = @transform_3, window_bounds = array<i64: 128, 128>}, {pipeline_mode = #tpu.pipeline_mode<synchronous>, transform_indices = @transform_4, window_bounds = array<i64: 1, 128>}, {pipeline_mode = #tpu.pipeline_mode<synchronous>, transform_indices = @transform_5, window_bounds = array<i64: 128, 128>}, {pipeline_mode = #tpu.pipeline_mode<synchronous>, transform_indices = @transform_6, window_bounds = array<i64: 1, 128>}, {transform_indices = @transform_7, window_bounds = array<i64: 8, 128>}]} {
    %c0 = arith.constant 0 : index
    %c0_0 = arith.constant 0 : index
    %0 = vector.load %arg1[%c0, %c0_0] : memref<8x16xbf16, #tpu.memory_space<vmem>>, vector<8x16xbf16>
    %c0_1 = arith.constant 0 : index
    %c0_2 = arith.constant 0 : index
    %1 = vector.load %arg2[%c0_1, %c0_2] : memref<16x128xbf16, #tpu.memory_space<vmem>>, vector<16x128xbf16>
    %cst = arith.constant dense<0.000000e+00> : vector<8x128xf32>
    %2 = tpu.matmul %0, %1, %cst {dimension_numbers = #tpu.dot_dimension_numbers<[1], [0], [0], [1], [0, 0, 1, 1], [], []>} : vector<8x16xbf16>, vector<16x128xbf16>, vector<8x128xf32> -> vector<8x128xf32>
    %c0_3 = arith.constant 0 : index
    %c0_4 = arith.constant 0 : index
    %3 = vector.load %arg3[%c0_3, %c0_4] : memref<1x128xf32, #tpu.memory_space<vmem>>, vector<1x128xf32>
    %4 = vector.broadcast %3 : vector<1x128xf32> to vector<8x128xf32>
    %5 = arith.addf %2, %4 : vector<8x128xf32>
    %cst_5 = arith.constant 0.000000e+00 : f32
    %6 = vector.broadcast %cst_5 : f32 to vector<8x128xf32>
    %7 = arith.maximumf %5, %6 : vector<8x128xf32>
    %8 = arith.truncf %7 : vector<8x128xf32> to vector<8x128xbf16>
    %c0_6 = arith.constant 0 : index
    %c0_7 = arith.constant 0 : index
    %9 = vector.load %arg4[%c0_6, %c0_7] : memref<128x128xbf16, #tpu.memory_space<vmem>>, vector<128x128xbf16>
    %cst_8 = arith.constant dense<0.000000e+00> : vector<8x128xf32>
    %10 = tpu.matmul %8, %9, %cst_8 {dimension_numbers = #tpu.dot_dimension_numbers<[1], [0], [0], [1], [0, 0, 1, 1], [], []>} : vector<8x128xbf16>, vector<128x128xbf16>, vector<8x128xf32> -> vector<8x128xf32>
    %c0_9 = arith.constant 0 : index
    %c0_10 = arith.constant 0 : index
    %11 = vector.load %arg5[%c0_9, %c0_10] : memref<1x128xf32, #tpu.memory_space<vmem>>, vector<1x128xf32>
    %12 = vector.broadcast %11 : vector<1x128xf32> to vector<8x128xf32>
    %13 = arith.addf %10, %12 : vector<8x128xf32>
    %cst_11 = arith.constant 0.000000e+00 : f32
    %14 = vector.broadcast %cst_11 : f32 to vector<8x128xf32>
    %15 = arith.maximumf %13, %14 : vector<8x128xf32>
    %16 = arith.truncf %15 : vector<8x128xf32> to vector<8x128xbf16>
    %c0_12 = arith.constant 0 : index
    %c0_13 = arith.constant 0 : index
    %17 = vector.load %arg6[%c0_12, %c0_13] : memref<128x128xbf16, #tpu.memory_space<vmem>>, vector<128x128xbf16>
    %cst_14 = arith.constant dense<0.000000e+00> : vector<8x128xf32>
    %18 = tpu.matmul %16, %17, %cst_14 {dimension_numbers = #tpu.dot_dimension_numbers<[1], [0], [0], [1], [0, 0, 1, 1], [], []>} : vector<8x128xbf16>, vector<128x128xbf16>, vector<8x128xf32> -> vector<8x128xf32>
    %c0_15 = arith.constant 0 : index
    %c0_16 = arith.constant 0 : index
    %19 = vector.load %arg7[%c0_15, %c0_16] : memref<1x128xf32, #tpu.memory_space<vmem>>, vector<1x128xf32>
    %20 = vector.broadcast %19 : vector<1x128xf32> to vector<8x128xf32>
    %21 = arith.addf %18, %20 : vector<8x128xf32>
    %c0_17 = arith.constant 0 : index
    %c0_18 = arith.constant 0 : index
    %22 = vector.load %arg8[%c0_17, %c0_18] : memref<8x128xf32, #tpu.memory_space<vmem>>, vector<8x128xf32>
    tpu.vector_store %arg8[%c0_17, %c0_18], %21 {strides = array<i32>} : memref<8x128xf32, #tpu.memory_space<vmem>>, vector<8x128xf32>,
    return
  }
  func.func @transform_0(%arg0: i32) -> (i32, i32) {
    %c0_i32 = arith.constant 0 : i32
    %c0_i32_0 = arith.constant 0 : i32
    return %arg0, %c0_i32 : i32, i32
  }
  func.func @transform_1(%arg0: i32) -> (i32, i32) {
    %c0_i32 = arith.constant 0 : i32
    %c0_i32_0 = arith.constant 0 : i32
    %c0_i32_1 = arith.constant 0 : i32
    return %c0_i32, %c0_i32_0 : i32, i32
  }
  func.func @transform_2(%arg0: i32) -> (i32, i32) {
    %c0_i32 = arith.constant 0 : i32
    %c0_i32_0 = arith.constant 0 : i32
    %c0_i32_1 = arith.constant 0 : i32
    return %c0_i32, %c0_i32_0 : i32, i32
  }
  func.func @transform_3(%arg0: i32) -> (i32, i32) {
    %c0_i32 = arith.constant 0 : i32
    %c0_i32_0 = arith.constant 0 : i32
    %c0_i32_1 = arith.constant 0 : i32
    return %c0_i32, %c0_i32_0 : i32, i32
  }
  func.func @transform_4(%arg0: i32) -> (i32, i32) {
    %c0_i32 = arith.constant 0 : i32
    %c0_i32_0 = arith.constant 0 : i32
    %c0_i32_1 = arith.constant 0 : i32
    return %c0_i32, %c0_i32_0 : i32, i32
  }
  func.func @transform_5(%arg0: i32) -> (i32, i32) {
    %c0_i32 = arith.constant 0 : i32
    %c0_i32_0 = arith.constant 0 : i32
    %c0_i32_1 = arith.constant 0 : i32
    return %c0_i32, %c0_i32_0 : i32, i32
  }
  func.func @transform_6(%arg0: i32) -> (i32, i32) {
    %c0_i32 = arith.constant 0 : i32
    %c0_i32_0 = arith.constant 0 : i32
    %c0_i32_1 = arith.constant 0 : i32
    return %c0_i32, %c0_i32_0 : i32, i32
  }
  func.func @transform_7(%arg0: i32) -> (i32, i32) {
    %c0_i32 = arith.constant 0 : i32
    %c0_i32_0 = arith.constant 0 : i32
    return %arg0, %c0_i32 : i32, i32
  }
}

module attributes {stable_mosaic.version = 11 : i64} {
  func.func @_mlp_kernel(%arg0: i32, %arg1: memref<8x16xbf16, #tpu.memory_space<vmem>>, %arg2: memref<16x128xbf16, #tpu.memory_space<vmem>>, %arg3: memref<1x128xf32, #tpu.memory_space<vmem>>, %arg4: memref<128x128xbf16, #tpu.memory_space<vmem>>, %arg5: memref<1x128xf32, #tpu.memory_space<vmem>>, %arg6: memref<128x128xbf16, #tpu.memory_space<vmem>>, %arg7: memref<1x128xf32, #tpu.memory_space<vmem>>, %arg8: memref<8x128xf32, #tpu.memory_space<vmem>>) attributes {dimension_semantics = [#tpu.dimension_semantics<parallel>], iteration_bounds = array<i64: 2>, scalar_prefetch = 0 : i64, scratch_operands = 0 : i64, tpu.core_type = #tpu.core_type<tc>, window_params = [{transform_indices = @transform_0, window_bounds = array<i64: 8, 16>}, {pipeline_mode = #tpu.pipeline_mode<synchronous>, transform_indices = @transform_1, window_bounds = array<i64: 16, 128>}, {pipeline_mode = #tpu.pipeline_mode<synchronous>, transform_indices = @transform_2, window_bounds = array<i64: 1, 128>}, {pipeline_mode = #tpu.pipeline_mode<synchronous>, transform_indices = @transform_3, window_bounds = array<i64: 128, 128>}, {pipeline_mode = #tpu.pipeline_mode<synchronous>, transform_indices = @transform_4, window_bounds = array<i64: 1, 128>}, {pipeline_mode = #tpu.pipeline_mode<synchronous>, transform_indices = @transform_5, window_bounds = array<i64: 128, 128>}, {pipeline_mode = #tpu.pipeline_mode<synchronous>, transform_indices = @transform_6, window_bounds = array<i64: 1, 128>}, {transform_indices = @transform_7, window_bounds = array<i64: 8, 128>}]} {
    %c0 = arith.constant 0 : index
    %c0_0 = arith.constant 0 : index
    %0 = vector.load %arg1[%c0, %c0_0] : memref<8x16xbf16, #tpu.memory_space<vmem>>, vector<8x16xbf16>
    %c0_1 = arith.constant 0 : index
    %c0_2 = arith.constant 0 : index
    %1 = vector.load %arg2[%c0_1, %c0_2] : memref<16x128xbf16, #tpu.memory_space<vmem>>, vector<16x128xbf16>
    %cst = arith.constant dense<0.000000e+00> : vector<8x128xf32>
    %2 = tpu.matmul %0, %1, %cst {dimension_numbers = #tpu.dot_dimension_numbers<[1], [0], [0], [1], [0, 0, 1, 1], [], []>} : vector<8x16xbf16>, vector<16x128xbf16>, vector<8x128xf32> -> vector<8x128xf32>
    %c0_3 = arith.constant 0 : index
    %c0_4 = arith.constant 0 : index
    %3 = vector.load %arg3[%c0_3, %c0_4] : memref<1x128xf32, #tpu.memory_space<vmem>>, vector<1x128xf32>
    %4 = vector.broadcast %3 : vector<1x128xf32> to vector<8x128xf32>
    %5 = arith.addf %2, %4 : vector<8x128xf32>
    %cst_5 = arith.constant 0.000000e+00 : f32
    %6 = vector.broadcast %cst_5 : f32 to vector<8x128xf32>
    %7 = arith.maximumf %5, %6 : vector<8x128xf32>
    %8 = arith.truncf %7 : vector<8x128xf32> to vector<8x128xbf16>
    %c0_6 = arith.constant 0 : index
    %c0_7 = arith.constant 0 : index
    %9 = vector.load %arg4[%c0_6, %c0_7] : memref<128x128xbf16, #tpu.memory_space<vmem>>, vector<128x128xbf16>
    %cst_8 = arith.constant dense<0.000000e+00> : vector<8x128xf32>
    %10 = tpu.matmul %8, %9, %cst_8 {dimension_numbers = #tpu.dot_dimension_numbers<[1], [0], [0], [1], [0, 0, 1, 1], [], []>} : vector<8x128xbf16>, vector<128x128xbf16>, vector<8x128xf32> -> vector<8x128xf32>
    %c0_9 = arith.constant 0 : index
    %c0_10 = arith.constant 0 : index
    %11 = vector.load %arg5[%c0_9, %c0_10] : memref<1x128xf32, #tpu.memory_space<vmem>>, vector<1x128xf32>
    %12 = vector.broadcast %11 : vector<1x128xf32> to vector<8x128xf32>
    %13 = arith.addf %10, %12 : vector<8x128xf32>
    %cst_11 = arith.constant 0.000000e+00 : f32
    %14 = vector.broadcast %cst_11 : f32 to vector<8x128xf32>
    %15 = arith.maximumf %13, %14 : vector<8x128xf32>
    %16 = arith.truncf %15 : vector<8x128xf32> to vector<8x128xbf16>
    %c0_12 = arith.constant 0 : index
    %c0_13 = arith.constant 0 : index
    %17 = vector.load %arg6[%c0_12, %c0_13] : memref<128x128xbf16, #tpu.memory_space<vmem>>, vector<128x128xbf16>
    %cst_14 = arith.constant dense<0.000000e+00> : vector<8x128xf32>
    %18 = tpu.matmul %16, %17, %cst_14 {dimension_numbers = #tpu.dot_dimension_numbers<[1], [0], [0], [1], [0, 0, 1, 1], [], []>} : vector<8x128xbf16>, vector<128x128xbf16>, vector<8x128xf32> -> vector<8x128xf32>
    %c0_15 = arith.constant 0 : index
    %c0_16 = arith.constant 0 : index
    %19 = vector.load %arg7[%c0_15, %c0_16] : memref<1x128xf32, #tpu.memory_space<vmem>>, vector<1x128xf32>
    %20 = vector.broadcast %19 : vector<1x128xf32> to vector<8x128xf32>
    %21 = arith.addf %18, %20 : vector<8x128xf32>
    %c0_17 = arith.constant 0 : index
    %c0_18 = arith.constant 0 : index
    %22 = vector.load %arg8[%c0_17, %c0_18] : memref<8x128xf32, #tpu.memory_space<vmem>>, vector<8x128xf32>
    tpu.vector_store %arg8[%c0_17, %c0_18], %21 {strides = array<i32>} : memref<8x128xf32, #tpu.memory_space<vmem>>, vector<8x128xf32>,
    return
  }
  func.func @transform_0(%arg0: i32) -> (i32, i32) {
    %c0_i32 = arith.constant 0 : i32
    %c0_i32_0 = arith.constant 0 : i32
    return %arg0, %c0_i32 : i32, i32
  }
  func.func @transform_1(%arg0: i32) -> (i32, i32) {
    %c0_i32 = arith.constant 0 : i32
    %c0_i32_0 = arith.constant 0 : i32
    %c0_i32_1 = arith.constant 0 : i32
    return %c0_i32, %c0_i32_0 : i32, i32
  }
  func.func @transform_2(%arg0: i32) -> (i32, i32) {
    %c0_i32 = arith.constant 0 : i32
    %c0_i32_0 = arith.constant 0 : i32
    %c0_i32_1 = arith.constant 0 : i32
    return %c0_i32, %c0_i32_0 : i32, i32
  }
  func.func @transform_3(%arg0: i32) -> (i32, i32) {
    %c0_i32 = arith.constant 0 : i32
    %c0_i32_0 = arith.constant 0 : i32
    %c0_i32_1 = arith.constant 0 : i32
    return %c0_i32, %c0_i32_0 : i32, i32
  }
  func.func @transform_4(%arg0: i32) -> (i32, i32) {
    %c0_i32 = arith.constant 0 : i32
    %c0_i32_0 = arith.constant 0 : i32
    %c0_i32_1 = arith.constant 0 : i32
    return %c0_i32, %c0_i32_0 : i32, i32
  }
  func.func @transform_5(%arg0: i32) -> (i32, i32) {
    %c0_i32 = arith.constant 0 : i32
    %c0_i32_0 = arith.constant 0 : i32
    %c0_i32_1 = arith.constant 0 : i32
    return %c0_i32, %c0_i32_0 : i32, i32
  }
  func.func @transform_6(%arg0: i32) -> (i32, i32) {
    %c0_i32 = arith.constant 0 : i32
    %c0_i32_0 = arith.constant 0 : i32
    %c0_i32_1 = arith.constant 0 : i32
    return %c0_i32, %c0_i32_0 : i32, i32
  }
  func.func @transform_7(%arg0: i32) -> (i32, i32) {
    %c0_i32 = arith.constant 0 : i32
    %c0_i32_0 = arith.constant 0 : i32
    return %arg0, %c0_i32 : i32, i32
  }
}

</mosaic_0001>

<bundles_post_ra>
// kernel: _forward_impl.1
= control target key start
LH: loop header
LB: loop body
LE: loop exit
PB: predicated region body
PF: predicated region fallthrough
CT: control target
= control target key end

     0   :  { %12 = vsyncpa [#allocation3], 0  ;;  %s1067_s0 = inlined_call_operand.vmem [shape: bf16[16,16], index: 0, kind: input, shape index: {}]   ;;  %s1068_s1 = inlined_call_operand.vmem [shape: bf16[16,128], index: 1, kind: input, shape index: {}]   ;;  %s1069_s2 = inlined_call_operand.vmem [shape: f32[1,128], index: 2, kind: input, shape index: {}]   ;;  %s1070_s3 = inlined_call_operand.hbm [shape: bf16[128,128], index: 3, kind: input, shape index: {}]   ;;  %s1071_s4 = inlined_call_operand.vmem [shape: f32[1,128], index: 4, kind: input, shape index: {}]   ;;  %s1072_s5 = inlined_call_operand.hbm [shape: bf16[128,128], index: 5, kind: input, shape index: {}]   ;;  %s1073_s6 = inlined_call_operand.vmem [shape: f32[1,128], index: 6, kind: input, shape index: {}]   ;;  %s1074_s7 = inlined_call_operand.vmem [shape: f32[16,128], index: 7, kind: output, shape index: {}]  }
   0x1   :  { %13 = vsyncpa [#allocation5], 0  ;;  %s935_s24 = smov 0  }
   0x2 LB: > { %s941_s25 = sadd.s32 4294967295, %s887_s24   ;;  %p669_p0 = scmp.ge.s32.totalorder %s887_s24, 1  ;;  %s887_s24 = sphi %s935_s24, %s19_s24  }
   0x3   : > { %p202_p1 = scmp.lt.s32.totalorder %s887_s24, 3  ;;  %s889_s26 = smov [#allocation2]  }
   0x4   : > { %s220_s27 = sshll.u32 %s889_s26, 4  ;;  %p1075_p3 = scmp.eq.s32.totalorder %s941_s25, 0  ;;  %s221_s27 = int_to_ptr.vmem [resolvable:$true] %s220_s27 }
   0x5   : > { %p945_p2 = pnand %p669_p0, %p202_p1  ;;  %s890_s29 = smov [#allocation4]  }
   0x6   : > { %s236_s30 = sshll.u32 %s890_s29, 4  ;;  %s817_s11 = scalar_lea.hbm %s1070_s3, 1024  ;;  %s958_s30 = int_to_ptr.vmem [resolvable:$true] %s236_s30 }
   0x7   : > { %s1077_s28 = scalar_select %p945_p2, 1, 0 }
   0x8   : > { %p775_p4 = pneg %p945_p2  ;;  %p818_p6 = scmp.ne.s32.totalorder %s1070_s3, %s817_s11 }
   0x9   : > { %p824_p10 = scmp.lt.u32.totalorder %s817_s11, %s1070_s3 }
   0xa   : > { %p954_p5 = pnand %p1075_p3, %p775_p4 }
   0xc   : > { %p819_p7 = pneg %p954_p5 }
   0xe   : > { %p820_p8 = pnand %p819_p7, %p818_p6 }
  0x10   : > { %p821_p9 = pneg %p820_p8 }
  0x12   : > { %p826_p11 = pnand %p824_p10, %p821_p9 }
  0x14   : > { %829 = shalt.err (!%p826_p11)
}
  0x15   : > { %s830_s16 = scalar_lea.vmem %s221_s27, 1024  ;;  %p838_p1 = scmp.lt.s32.totalorder %s221_s27, %s221_s27 }
  0x16   : > { %p831_p12 = scmp.ne.s32.totalorder %s221_s27, %s830_s16  ;;  %p839_p4 = scmp.lt.s32.totalorder %s830_s16, %s830_s16 }
  0x18   : > { %p833_p13 = pnand %p831_p12, %p819_p7  ;;  %p840_p3 = por %p839_p4, %p838_p1 }
  0x1a   : > { %p834_p0 = pneg %p833_p13 }
  0x1c   : > { %p841_p2 = pnand %p840_p3, %p834_p0 }
  0x1e   : > { %844 = shalt.err (!%p841_p2)
}
  0x1f   : > { %s891_s17 = smov 64   ;;  %s892_s18 = smov 4  }
  0x20   : > { %778 = dma.hbm_to_vmem [thread:$0]  (!%p954_p5), %s1070_s3, 1024, %s221_s27, [#allocation3], %s891_s17, %s891_s17, %s892_s18  }
  0x21   : > { %s845_s23 = scalar_lea.hbm %s1072_s5, 1024 }
  0x22   : > { %p846_p6 = scmp.ne.s32.totalorder %s1072_s5, %s845_s23  ;;  %p852_p8 = scmp.lt.u32.totalorder %s845_s23, %s1072_s5 }
  0x24   : > { %p848_p2 = pnand %p846_p6, %p819_p7 }
  0x26   : > { %p849_p3 = pneg %p848_p2 }
  0x28   : > { %p854_p9 = pnand %p852_p8, %p849_p3 }
  0x2a   : > { %857 = shalt.err (!%p854_p9)
}
  0x2b   : > { %s858_s27 = scalar_lea.vmem %s958_s30, 1024  ;;  %p866_p13 = scmp.lt.s32.totalorder %s958_s30, %s958_s30 }
  0x2c   : > { %p859_p10 = scmp.ne.s32.totalorder %s958_s30, %s858_s27  ;;  %p867_p0 = scmp.lt.s32.totalorder %s858_s27, %s858_s27 }
  0x2e   : > { %p861_p11 = pnand %p859_p10, %p819_p7  ;;  %p868_p1 = por %p867_p0, %p866_p13 }
  0x30   : > { %p862_p12 = pneg %p861_p11 }
  0x32   : > { %p869_p4 = pnand %p868_p1, %p862_p12 }
  0x34   : > { %872 = shalt.err (!%p869_p4)
}
  0x35   : > { %781 = dma.hbm_to_vmem [thread:$0]  (!%p954_p5), %s1072_s5, 1024, %s958_s30, [#allocation5], %s891_s17, %s891_s17, %s892_s18  }
  0x36   : > { %p1079_p6 = scmp.ne.s32.totalorder %s1077_s28, 0 }
  0x37   : > { %p1080_p2 = scmp.eq.s32.totalorder (!%p1079_p6), %s941_s25, 0 }
  0x38   : > { %262 = sbr.rel (%p1079_p6) target bundleno = 724 (0x2d4), region = 48 }
  0x3f   : > { %878 = dma.done.wait (%p1080_p2), [#allocation3], 1024   ;;  %p1081_p7 = pmov %p1080_p2 }
  0x40   : > { %p1082_p3 = pmov %p1080_p2 }
  0x41   : > { %880 = vsyncadd (%p1081_p7), [#allocation3], 4294966272 }
  0x42   : > { %882 = dma.done.wait (%p1082_p3), [#allocation5], 1024   ;;  %p1083_p8 = pmov %p1080_p2 }
  0x43   : > { %p296_p9 = scmp.lt.s32.totalorder %s941_s25, 1  ;;  %v893_v0 = vmov 0.0   ;;  %vm894_vm0 = vmmov 0   ;;  %v800_v1 = vld [vmem:[%s1068_s1] sm:$0xff]   ;;  %vm321_vm1 = vcmask 130048   ;;  %v802_v4 = vld [vmem:[#allocation2 + $0x8] sm:$0xff]  }
  0x44   : > { %884 = vsyncadd (%p1083_p8), [#allocation5], 4294966272  ;;  %721 = vmatprep.subr.bf16.mxu0 %v893_v0  ;;  %723 = vmatprep.mubr.msk.bf16.mxu0 %vm894_vm0, %v893_v0  ;;  %v801_v3 = vld [vmem:[#allocation2] sm:$0xff]   ;;  %v803_v5 = vld [vmem:[#allocation2 + $0x10] sm:$0xff]  }
  0x45   : > { %s1085_s25 = smov (!%p296_p9, %s941_s25), 1  ;;  %727 = vmatprep.subr.bf16.mxu1 %v893_v0  ;;  %743 = vmatprep.mubr.msk.bf16.mxu1 %vm894_vm0, %v893_v0  ;;  %v804_v6 = vld [vmem:[#allocation2 + $0x18] sm:$0xff]   ;;  %v805_v7 = vld [vmem:[#allocation2 + $0x20] sm:$0xff]   ;;  %v806_v8 = vld [vmem:[#allocation2 + $0x28] sm:$0xff]  }
  0x46   : > { %s676_s28 = sshll.u32 %s1085_s25, 2  ;;  %722 = vmatpush3.bf16.msra.mxu0 %v800_v1  ;;  %728 = vmatpush3.bf16.msra.mxu1 %v801_v3  ;;  %v807_v9 = vld [vmem:[#allocation2 + $0x30] sm:$0xff]   ;;  %v808_v10 = vld [vmem:[#allocation2 + $0x38] sm:$0xff]   ;;  %v809_v11 = vld [vmem:[#allocation4] sm:$0xff]   ;;  %s677_s20 = sshll.u32 %s1085_s25, 3 }
  0x47   : > { %s299_s13 = scalar_lea.vmem %s1067_s0, %s676_s28  ;;  %747 = vmatprep.subr.bf16.mxu0 %v893_v0  ;;  %729 = vmatprep.subr.bf16.mxu1 %v893_v0  ;;  %v810_v12 = vld [vmem:[#allocation4 + $0x8] sm:$0xff]   ;;  %v811_v13 = vld [vmem:[#allocation4 + $0x10] sm:$0xff]   ;;  %v812_v14 = vld [vmem:[#allocation4 + $0x18] sm:$0xff]   ;;  %s303_s29 = scalar_lea.vmem %s1074_s7, %s677_s20 }
  0x48   : > { %v305_v2 = vld [vmem:[%s299_s13] sm:$0xf]  ;;  %v814_v16 = vld [vmem:[#allocation4 + $0x28] sm:$0xff]   ;;  %v815_v25 = vld [vmem:[#allocation4 + $0x30] sm:$0xff]  }
  0x49   : > { %724 = vmatmul.mubr.msk.bf16.vlgmr.msra.gmra.mrb[0].mxu0 %vm321_vm1, %v305_v2  ;;  %v813_v15 = vld [vmem:[#allocation4 + $0x20] sm:$0xff]   ;;  %v816_v26 = vld [vmem:[#allocation4 + $0x38] sm:$0xff]  }
  0x4a   : > { %763 = vmatprep.mubr.msk.bf16.mxu0 %vm894_vm0, %v893_v0  ;;  %730 = vmatpush3.bf16.msra.mxu1 %v802_v4  ;;  %v678_v17 = vld [vmem:[%s1069_s2] ss:$0 sm:$0xff] }
  0x4b   : > { %731 = vmatprep.subr.bf16.mxu1 %v893_v0  ;;  %748 = vmatpush3.bf16.msra.mxu0 %v809_v11  ;;  %v681_v27 = vld [vmem:[%s1071_s4] ss:$0 sm:$0xff] }
  0x4c   : > { %749 = vmatprep.subr.bf16.mxu0 %v893_v0  ;;  %v690_v35 = vld [vmem:[%s1073_s6] ss:$0 sm:$0xff] }
  0x4e   : > { %732 = vmatpush3.bf16.msra.mxu1 %v803_v5 }
  0x4f   : > { %733 = vmatprep.subr.bf16.mxu1 %v893_v0  ;;  %750 = vmatpush3.bf16.msra.mxu0 %v810_v12 }
  0x50   : > { %751 = vmatprep.subr.bf16.mxu0 %v893_v0 }
  0x52   : > { %734 = vmatpush3.bf16.msra.mxu1 %v804_v6 }
  0x53   : > { %735 = vmatprep.subr.bf16.mxu1 %v893_v0  ;;  %752 = vmatpush3.bf16.msra.mxu0 %v811_v13 }
  0x54   : > { %753 = vmatprep.subr.bf16.mxu0 %v893_v0 }
  0x56   : > { %736 = vmatpush3.bf16.msra.mxu1 %v805_v7 }
  0x57   : > { %737 = vmatprep.subr.bf16.mxu1 %v893_v0  ;;  %754 = vmatpush3.bf16.msra.mxu0 %v812_v14 }
  0x58   : > { %755 = vmatprep.subr.bf16.mxu0 %v893_v0 }
  0x5a   : > { %738 = vmatpush3.bf16.msra.mxu1 %v806_v8 }
  0x5b   : > { %739 = vmatprep.subr.bf16.mxu1 %v893_v0  ;;  %756 = vmatpush3.bf16.msra.mxu0 %v813_v15 }
  0x5c   : > { %757 = vmatprep.subr.bf16.mxu0 %v893_v0 }
  0x5e   : > { %740 = vmatpush3.bf16.msra.mxu1 %v807_v9 }
  0x5f   : > { %741 = vmatprep.subr.bf16.mxu1 %v893_v0  ;;  %758 = vmatpush3.bf16.msra.mxu0 %v814_v16 }
  0x60   : > { %759 = vmatprep.subr.bf16.mxu0 %v893_v0 }
  0x62   : > { %742 = vmatpush3.bf16.msra.mxu1 %v808_v10 }
  0x63   : > { %760 = vmatpush3.bf16.msra.mxu0 %v815_v25 }
  0x64   : > { %761 = vmatprep.subr.bf16.mxu0 %v893_v0 }
  0x67   : > { %762 = vmatpush3.bf16.msra.mxu0 %v816_v26 }
 0x11c   : > { %v359_v18 = vpop.f32.mrb[0].mxu0 }
 0x11d   : > { %v360_v19 = vadd.f32 %v678_v17, %v359_v18  ;;  %v725_v20 = vpop.f32.mrb[1].mxu0 }
 0x11e   : > { %v362_v21 = vpop.f32.mrb[2].mxu0 }
 0x11f   : > { %v365_v22 = vmax.f32 %v360_v19, 0.0  ;;  %v726_v23 = vpop.f32.mrb[3].mxu0 }
 0x121   : > { %v366_v24 = vpack.c.bf16 %v365_v22, %v365_v22 }
 0x123   : > { %744 = vmatmul.mubr.bf16.vlgmr.msra.gmra.mrb[0].mxu1 %v366_v24 }
 0x1f6   : > { %v472_v28 = vpop.f32.mrb[0].mxu1 }
 0x1f7   : > { %v473_v29 = vadd.f32 %v681_v27, %v472_v28  ;;  %v745_v30 = vpop.f32.mrb[1].mxu1 }
 0x1f8   : > { %v475_v31 = vpop.f32.mrb[2].mxu1 }
 0x1f9   : > { %v478_v32 = vmax.f32 %v473_v29, 0.0  ;;  %v746_v33 = vpop.f32.mrb[3].mxu1 }
 0x1fb   : > { %v479_v34 = vpack.c.bf16 %v478_v32, %v478_v32 }
 0x1fd   : > { %764 = vmatmul.mubr.bf16.vlgmr.msra.gmra.mrb[4].mxu0 %v479_v34 }
 0x2d0   : > { %v585_v36 = vpop.f32.mrb[4].mxu0 }
 0x2d1   : > { %v586_v37 = vadd.f32 %v690_v35, %v585_v36  ;;  %v765_v38 = vpop.f32.mrb[5].mxu0 }
 0x2d2   : > { %v588_v39 = vpop.f32.mrb[6].mxu0 }
 0x2d3   : > { %591 = vst [vmem:[%s303_s29] sm:$0xff] %v586_v37  ;;  %v766_v40 = vpop.f32.mrb[7].mxu0 }
 0x2d4 PF: > { %s19_s24 = sadd.s32 1, %s887_s24  }
 0x2d5   : > { %p16_p5 = scmp.ge.s32.totalorder %s19_s24, 4  }
 0x2d7   :  { %18 = sbr.rel (!%p16_p5) target bundleno = 2 (0x2), region = 87 }
 0x2de   :  { %611 = vsyncpa [#allocation3], 1 }
 0x2df   :  { %613 = vsyncpa [#allocation3 + $0x1], 1 }
 0x2e0   :  { %614 = vsyncpa [#allocation5], 1 }

// kernel: _forward_impl.1
= control target key start
LH: loop header
LB: loop body
LE: loop exit
PB: predicated region body
PF: predicated region fallthrough
CT: control target
= control target key end

     0   :  { %12 = vsyncpa [#allocation3], 0  ;;  %s1067_s0 = inlined_call_operand.vmem [shape: bf16[16,16], index: 0, kind: input, shape index: {}]   ;;  %s1068_s1 = inlined_call_operand.vmem [shape: bf16[16,128], index: 1, kind: input, shape index: {}]   ;;  %s1069_s2 = inlined_call_operand.vmem [shape: f32[1,128], index: 2, kind: input, shape index: {}]   ;;  %s1070_s3 = inlined_call_operand.hbm [shape: bf16[128,128], index: 3, kind: input, shape index: {}]   ;;  %s1071_s4 = inlined_call_operand.vmem [shape: f32[1,128], index: 4, kind: input, shape index: {}]   ;;  %s1072_s5 = inlined_call_operand.hbm [shape: bf16[128,128], index: 5, kind: input, shape index: {}]   ;;  %s1073_s6 = inlined_call_operand.vmem [shape: f32[1,128], index: 6, kind: input, shape index: {}]   ;;  %s1074_s7 = inlined_call_operand.vmem [shape: f32[16,128], index: 7, kind: output, shape index: {}]  }
   0x1   :  { %13 = vsyncpa [#allocation5], 0  ;;  %s935_s24 = smov 0  }
   0x2 LB: > { %s941_s25 = sadd.s32 4294967295, %s887_s24   ;;  %p669_p0 = scmp.ge.s32.totalorder %s887_s24, 1  ;;  %s887_s24 = sphi %s935_s24, %s19_s24  }
   0x3   : > { %p202_p1 = scmp.lt.s32.totalorder %s887_s24, 3  ;;  %s889_s26 = smov [#allocation2]  }
   0x4   : > { %s220_s27 = sshll.u32 %s889_s26, 4  ;;  %p1075_p3 = scmp.eq.s32.totalorder %s941_s25, 0  ;;  %s221_s27 = int_to_ptr.vmem [resolvable:$true] %s220_s27 }
   0x5   : > { %p945_p2 = pnand %p669_p0, %p202_p1  ;;  %s890_s29 = smov [#allocation4]  }
   0x6   : > { %s236_s30 = sshll.u32 %s890_s29, 4  ;;  %s817_s11 = scalar_lea.hbm %s1070_s3, 1024  ;;  %s958_s30 = int_to_ptr.vmem [resolvable:$true] %s236_s30 }
   0x7   : > { %s1077_s28 = scalar_select %p945_p2, 1, 0 }
   0x8   : > { %p775_p4 = pneg %p945_p2  ;;  %p818_p6 = scmp.ne.s32.totalorder %s1070_s3, %s817_s11 }
   0x9   : > { %p824_p10 = scmp.lt.u32.totalorder %s817_s11, %s1070_s3 }
   0xa   : > { %p954_p5 = pnand %p1075_p3, %p775_p4 }
   0xc   : > { %p819_p7 = pneg %p954_p5 }
   0xe   : > { %p820_p8 = pnand %p819_p7, %p818_p6 }
  0x10   : > { %p821_p9 = pneg %p820_p8 }
  0x12   : > { %p826_p11 = pnand %p824_p10, %p821_p9 }
  0x14   : > { %829 = shalt.err (!%p826_p11)
}
  0x15   : > { %s830_s16 = scalar_lea.vmem %s221_s27, 1024  ;;  %p838_p1 = scmp.lt.s32.totalorder %s221_s27, %s221_s27 }
  0x16   : > { %p831_p12 = scmp.ne.s32.totalorder %s221_s27, %s830_s16  ;;  %p839_p4 = scmp.lt.s32.totalorder %s830_s16, %s830_s16 }
  0x18   : > { %p833_p13 = pnand %p831_p12, %p819_p7  ;;  %p840_p3 = por %p839_p4, %p838_p1 }
  0x1a   : > { %p834_p0 = pneg %p833_p13 }
  0x1c   : > { %p841_p2 = pnand %p840_p3, %p834_p0 }
  0x1e   : > { %844 = shalt.err (!%p841_p2)
}
  0x1f   : > { %s891_s17 = smov 64   ;;  %s892_s18 = smov 4  }
  0x20   : > { %778 = dma.hbm_to_vmem [thread:$0]  (!%p954_p5), %s1070_s3, 1024, %s221_s27, [#allocation3], %s891_s17, %s891_s17, %s892_s18  }
  0x21   : > { %s845_s23 = scalar_lea.hbm %s1072_s5, 1024 }
  0x22   : > { %p846_p6 = scmp.ne.s32.totalorder %s1072_s5, %s845_s23  ;;  %p852_p8 = scmp.lt.u32.totalorder %s845_s23, %s1072_s5 }
  0x24   : > { %p848_p2 = pnand %p846_p6, %p819_p7 }
  0x26   : > { %p849_p3 = pneg %p848_p2 }
  0x28   : > { %p854_p9 = pnand %p852_p8, %p849_p3 }
  0x2a   : > { %857 = shalt.err (!%p854_p9)
}
  0x2b   : > { %s858_s27 = scalar_lea.vmem %s958_s30, 1024  ;;  %p866_p13 = scmp.lt.s32.totalorder %s958_s30, %s958_s30 }
  0x2c   : > { %p859_p10 = scmp.ne.s32.totalorder %s958_s30, %s858_s27  ;;  %p867_p0 = scmp.lt.s32.totalorder %s858_s27, %s858_s27 }
  0x2e   : > { %p861_p11 = pnand %p859_p10, %p819_p7  ;;  %p868_p1 = por %p867_p0, %p866_p13 }
  0x30   : > { %p862_p12 = pneg %p861_p11 }
  0x32   : > { %p869_p4 = pnand %p868_p1, %p862_p12 }
  0x34   : > { %872 = shalt.err (!%p869_p4)
}
  0x35   : > { %781 = dma.hbm_to_vmem [thread:$0]  (!%p954_p5), %s1072_s5, 1024, %s958_s30, [#allocation5], %s891_s17, %s891_s17, %s892_s18  }
  0x36   : > { %p1079_p6 = scmp.ne.s32.totalorder %s1077_s28, 0 }
  0x37   : > { %p1080_p2 = scmp.eq.s32.totalorder (!%p1079_p6), %s941_s25, 0 }
  0x38   : > { %262 = sbr.rel (%p1079_p6) target bundleno = 724 (0x2d4), region = 48 }
  0x3f   : > { %878 = dma.done.wait (%p1080_p2), [#allocation3], 1024   ;;  %p1081_p7 = pmov %p1080_p2 }
  0x40   : > { %p1082_p3 = pmov %p1080_p2 }
  0x41   : > { %880 = vsyncadd (%p1081_p7), [#allocation3], 4294966272 }
  0x42   : > { %882 = dma.done.wait (%p1082_p3), [#allocation5], 1024   ;;  %p1083_p8 = pmov %p1080_p2 }
  0x43   : > { %p296_p9 = scmp.lt.s32.totalorder %s941_s25, 1  ;;  %v893_v0 = vmov 0.0   ;;  %vm894_vm0 = vmmov 0   ;;  %v800_v1 = vld [vmem:[%s1068_s1] sm:$0xff]   ;;  %vm321_vm1 = vcmask 130048   ;;  %v802_v4 = vld [vmem:[#allocation2 + $0x8] sm:$0xff]  }
  0x44   : > { %884 = vsyncadd (%p1083_p8), [#allocation5], 4294966272  ;;  %721 = vmatprep.subr.bf16.mxu0 %v893_v0  ;;  %723 = vmatprep.mubr.msk.bf16.mxu0 %vm894_vm0, %v893_v0  ;;  %v801_v3 = vld [vmem:[#allocation2] sm:$0xff]   ;;  %v803_v5 = vld [vmem:[#allocation2 + $0x10] sm:$0xff]  }
  0x45   : > { %s1085_s25 = smov (!%p296_p9, %s941_s25), 1  ;;  %727 = vmatprep.subr.bf16.mxu1 %v893_v0  ;;  %743 = vmatprep.mubr.msk.bf16.mxu1 %vm894_vm0, %v893_v0  ;;  %v804_v6 = vld [vmem:[#allocation2 + $0x18] sm:$0xff]   ;;  %v805_v7 = vld [vmem:[#allocation2 + $0x20] sm:$0xff]   ;;  %v806_v8 = vld [vmem:[#allocation2 + $0x28] sm:$0xff]  }
  0x46   : > { %s676_s28 = sshll.u32 %s1085_s25, 2  ;;  %722 = vmatpush3.bf16.msra.mxu0 %v800_v1  ;;  %728 = vmatpush3.bf16.msra.mxu1 %v801_v3  ;;  %v807_v9 = vld [vmem:[#allocation2 + $0x30] sm:$0xff]   ;;  %v808_v10 = vld [vmem:[#allocation2 + $0x38] sm:$0xff]   ;;  %v809_v11 = vld [vmem:[#allocation4] sm:$0xff]   ;;  %s677_s20 = sshll.u32 %s1085_s25, 3 }
  0x47   : > { %s299_s13 = scalar_lea.vmem %s1067_s0, %s676_s28  ;;  %747 = vmatprep.subr.bf16.mxu0 %v893_v0  ;;  %729 = vmatprep.subr.bf16.mxu1 %v893_v0  ;;  %v810_v12 = vld [vmem:[#allocation4 + $0x8] sm:$0xff]   ;;  %v811_v13 = vld [vmem:[#allocation4 + $0x10] sm:$0xff]   ;;  %v812_v14 = vld [vmem:[#allocation4 + $0x18] sm:$0xff]   ;;  %s303_s29 = scalar_lea.vmem %s1074_s7, %s677_s20 }
  0x48   : > { %v305_v2 = vld [vmem:[%s299_s13] sm:$0xf]  ;;  %v814_v16 = vld [vmem:[#allocation4 + $0x28] sm:$0xff]   ;;  %v815_v25 = vld [vmem:[#allocation4 + $0x30] sm:$0xff]  }
  0x49   : > { %724 = vmatmul.mubr.msk.bf16.vlgmr.msra.gmra.mrb[0].mxu0 %vm321_vm1, %v305_v2  ;;  %v813_v15 = vld [vmem:[#allocation4 + $0x20] sm:$0xff]   ;;  %v816_v26 = vld [vmem:[#allocation4 + $0x38] sm:$0xff]  }
  0x4a   : > { %763 = vmatprep.mubr.msk.bf16.mxu0 %vm894_vm0, %v893_v0  ;;  %730 = vmatpush3.bf16.msra.mxu1 %v802_v4  ;;  %v678_v17 = vld [vmem:[%s1069_s2] ss:$0 sm:$0xff] }
  0x4b   : > { %731 = vmatprep.subr.bf16.mxu1 %v893_v0  ;;  %748 = vmatpush3.bf16.msra.mxu0 %v809_v11  ;;  %v681_v27 = vld [vmem:[%s1071_s4] ss:$0 sm:$0xff] }
  0x4c   : > { %749 = vmatprep.subr.bf16.mxu0 %v893_v0  ;;  %v690_v35 = vld [vmem:[%s1073_s6] ss:$0 sm:$0xff] }
  0x4e   : > { %732 = vmatpush3.bf16.msra.mxu1 %v803_v5 }
  0x4f   : > { %733 = vmatprep.subr.bf16.mxu1 %v893_v0  ;;  %750 = vmatpush3.bf16.msra.mxu0 %v810_v12 }
  0x50   : > { %751 = vmatprep.subr.bf16.mxu0 %v893_v0 }
  0x52   : > { %734 = vmatpush3.bf16.msra.mxu1 %v804_v6 }
  0x53   : > { %735 = vmatprep.subr.bf16.mxu1 %v893_v0  ;;  %752 = vmatpush3.bf16.msra.mxu0 %v811_v13 }
  0x54   : > { %753 = vmatprep.subr.bf16.mxu0 %v893_v0 }
  0x56   : > { %736 = vmatpush3.bf16.msra.mxu1 %v805_v7 }
  0x57   : > { %737 = vmatprep.subr.bf16.mxu1 %v893_v0  ;;  %754 = vmatpush3.bf16.msra.mxu0 %v812_v14 }
  0x58   : > { %755 = vmatprep.subr.bf16.mxu0 %v893_v0 }
  0x5a   : > { %738 = vmatpush3.bf16.msra.mxu1 %v806_v8 }
  0x5b   : > { %739 = vmatprep.subr.bf16.mxu1 %v893_v0  ;;  %756 = vmatpush3.bf16.msra.mxu0 %v813_v15 }
  0x5c   : > { %757 = vmatprep.subr.bf16.mxu0 %v893_v0 }
  0x5e   : > { %740 = vmatpush3.bf16.msra.mxu1 %v807_v9 }
  0x5f   : > { %741 = vmatprep.subr.bf16.mxu1 %v893_v0  ;;  %758 = vmatpush3.bf16.msra.mxu0 %v814_v16 }
  0x60   : > { %759 = vmatprep.subr.bf16.mxu0 %v893_v0 }
  0x62   : > { %742 = vmatpush3.bf16.msra.mxu1 %v808_v10 }
  0x63   : > { %760 = vmatpush3.bf16.msra.mxu0 %v815_v25 }
  0x64   : > { %761 = vmatprep.subr.bf16.mxu0 %v893_v0 }
  0x67   : > { %762 = vmatpush3.bf16.msra.mxu0 %v816_v26 }
 0x11c   : > { %v359_v18 = vpop.f32.mrb[0].mxu0 }
 0x11d   : > { %v360_v19 = vadd.f32 %v678_v17, %v359_v18  ;;  %v725_v20 = vpop.f32.mrb[1].mxu0 }
 0x11e   : > { %v362_v21 = vpop.f32.mrb[2].mxu0 }
 0x11f   : > { %v365_v22 = vmax.f32 %v360_v19, 0.0  ;;  %v726_v23 = vpop.f32.mrb[3].mxu0 }
 0x121   : > { %v366_v24 = vpack.c.bf16 %v365_v22, %v365_v22 }
 0x123   : > { %744 = vmatmul.mubr.bf16.vlgmr.msra.gmra.mrb[0].mxu1 %v366_v24 }
 0x1f6   : > { %v472_v28 = vpop.f32.mrb[0].mxu1 }
 0x1f7   : > { %v473_v29 = vadd.f32 %v681_v27, %v472_v28  ;;  %v745_v30 = vpop.f32.mrb[1].mxu1 }
 0x1f8   : > { %v475_v31 = vpop.f32.mrb[2].mxu1 }
 0x1f9   : > { %v478_v32 = vmax.f32 %v473_v29, 0.0  ;;  %v746_v33 = vpop.f32.mrb[3].mxu1 }
 0x1fb   : > { %v479_v34 = vpack.c.bf16 %v478_v32, %v478_v32 }
 0x1fd   : > { %764 = vmatmul.mubr.bf16.vlgmr.msra.gmra.mrb[4].mxu0 %v479_v34 }
 0x2d0   : > { %v585_v36 = vpop.f32.mrb[4].mxu0 }
 0x2d1   : > { %v586_v37 = vadd.f32 %v690_v35, %v585_v36  ;;  %v765_v38 = vpop.f32.mrb[5].mxu0 }
 0x2d2   : > { %v588_v39 = vpop.f32.mrb[6].mxu0 }
 0x2d3   : > { %591 = vst [vmem:[%s303_s29] sm:$0xff] %v586_v37  ;;  %v766_v40 = vpop.f32.mrb[7].mxu0 }
 0x2d4 PF: > { %s19_s24 = sadd.s32 1, %s887_s24  }
 0x2d5   : > { %p16_p5 = scmp.ge.s32.totalorder %s19_s24, 4  }
 0x2d7   :  { %18 = sbr.rel (!%p16_p5) target bundleno = 2 (0x2), region = 87 }
 0x2de   :  { %611 = vsyncpa [#allocation3], 1 }
 0x2df   :  { %613 = vsyncpa [#allocation3 + $0x1], 1 }
 0x2e0   :  { %614 = vsyncpa [#allocation5], 1 }

</bundles_post_ra>
